<compile_context>
chip_gen: v7x
topology: tpu7x:2x2x1
jax: 0.10.0
libtpu: 0.0.40
codegen_flags: <defaults>
</compile_context>

<pallas_src>
import functools

import jax
import jax.numpy as jnp
from jax.experimental import pallas as pl
from jax.experimental.pallas import tpu as pltpu


def _edge_encoding_kernel(ids_ref, table_ref, gamma_ref, beta_ref, out_ref,
                          *, eps, hidden, pos_vocab):
    """One (TN, H_pad) output tile.

    ids_ref:   (TN, 3) int32   -- columns: [init_pos, hop_dis, time_dis]
    table_ref: (V_pad, H_pad) bf16 -- rows [0, Vp) = pos table, [Vp, Vp+Vh) = hop table
    gamma_ref: (1, H_pad) f32 (zero in padded lanes)
    beta_ref:  (1, H_pad) f32 (zero in padded lanes)
    out_ref:   (TN, H_pad)
    """
    tn = ids_ref.shape[0]
    v_pad = table_ref.shape[0]
    h_pad = out_ref.shape[1]

    ids = ids_ref[...]                              # (TN, 3) int32
    pos_id = ids[:, 0:1]                            # (TN, 1)
    hop_id = ids[:, 1:2] + pos_vocab                # offset into concatenated table
    time_id = ids[:, 2:3] + pos_vocab

    # Combined one-hot over the concatenated vocab. Segments are disjoint column
    # ranges, so a single column index compare per id is exact; hop==time yields
    # a count of 2 (exactly representable in bf16).
    col = jax.lax.broadcasted_iota(jnp.int32, (tn, v_pad), 1)
    counts = ((col == pos_id).astype(jnp.int32)
              + (col == hop_id).astype(jnp.int32)
              + (col == time_id).astype(jnp.int32))
    onehot = counts.astype(table_ref.dtype)         # bf16, values in {0, 1, 2}

    # Single fused lookup on the MXU, f32 accumulation.
    emb = jnp.dot(onehot, table_ref[...], preferred_element_type=jnp.float32)  # (TN, H_pad)

    # LayerNorm over the *real* hidden dim (padded table columns are zero, so they do
    # not perturb the sums; variance is masked to the real lanes).
    inv_h = 1.0 / float(hidden)
    mean = jnp.sum(emb, axis=-1, keepdims=True) * inv_h
    diff = emb - mean
    if hidden == h_pad:
        var = jnp.sum(diff * diff, axis=-1, keepdims=True) * inv_h
    else:
        lane = jax.lax.broadcasted_iota(jnp.int32, (tn, h_pad), 1)
        mask = (lane < hidden).astype(jnp.float32)
        var = jnp.sum(diff * diff * mask, axis=-1, keepdims=True) * inv_h
    x_hat = diff * jax.lax.rsqrt(var + eps)

    # Padded gamma/beta lanes are zero => padded output lanes are exactly zero.
    out = x_hat * gamma_ref[...] + beta_ref[...]

    # Dropout: identity at inference time.
    out_ref[...] = out.astype(out_ref.dtype)


def edge_encoding(init_pos_ids, hop_dis_ids, time_dis_ids,
                  pos_table, hop_table, gamma, beta,
                  *, eps=1e-12, block_rows=256, out_dtype=jnp.float32):
    """init_pos_ids/hop_dis_ids/time_dis_ids: int (B, S)
       pos_table: (Vp, H), hop_table: (Vh, H), gamma/beta: (H,)"""
    B, S = init_pos_ids.shape
    Vp, H = pos_table.shape
    Vh = hop_table.shape[0]
    N = B * S

    # ---- layout prep (wrapper side) ----
    # Lane-dense hidden dim.
    H_pad = pl.cdiv(H, 128) * 128
    # Row tile: 8-aligned, capped at block_rows; pad N up to a multiple of it.
    TN = min(block_rows, pl.cdiv(N, 8) * 8)
    N_pad = pl.cdiv(N, TN) * TN

    # Pack the three id streams into one contiguous (N, 3) int32 array.
    ids = jnp.stack([init_pos_ids.reshape(-1),
                     hop_dis_ids.reshape(-1),
                     time_dis_ids.reshape(-1)], axis=1).astype(jnp.int32)
    ids = jnp.pad(ids, ((0, N_pad - N), (0, 0)))

    # One concatenated bf16 table, zero-padded to (V_pad, H_pad).
    V_total = Vp + Vh
    V_pad = pl.cdiv(V_total, 8) * 8
    table = jnp.concatenate([pos_table, hop_table], axis=0).astype(jnp.bfloat16)
    table = jnp.pad(table, ((0, V_pad - V_total), (0, H_pad - H)))

    gamma_p = jnp.pad(gamma.astype(jnp.float32), (0, H_pad - H)).reshape(1, H_pad)
    beta_p = jnp.pad(beta.astype(jnp.float32), (0, H_pad - H)).reshape(1, H_pad)

    kernel = functools.partial(_edge_encoding_kernel,
                               eps=float(eps), hidden=H, pos_vocab=Vp)

    out = pl.pallas_call(
        kernel,
        out_shape=jax.ShapeDtypeStruct((N_pad, H_pad), out_dtype),
        grid=(N_pad // TN,),
        in_specs=[
            pl.BlockSpec((TN, 3), lambda i: (i, 0)),        # ids: tiled over rows
            pl.BlockSpec((V_pad, H_pad), lambda i: (0, 0)),  # table: grid-invariant
            pl.BlockSpec((1, H_pad), lambda i: (0, 0)),      # gamma: grid-invariant
            pl.BlockSpec((1, H_pad), lambda i: (0, 0)),      # beta:  grid-invariant
        ],
        out_specs=pl.BlockSpec((TN, H_pad), lambda i: (i, 0)),
        compiler_params=pltpu.CompilerParams(
            dimension_semantics=("parallel",)),
    )(ids, table, gamma_p, beta_p)

    return out[:N, :H].reshape(B, S, H)


def _layernorm_ref(x, gamma, beta, eps):
    mean = x.mean(-1, keepdims=True)
    var = ((x - mean) ** 2).mean(-1, keepdims=True)
    return (x - mean) * jax.lax.rsqrt(var + eps) * gamma + beta


if __name__ == "__main__":
    # Small config consistent with the module's __init__.
    max_inti_pos_index = 32
    max_hop_dis_index = 32
    hidden_size = 32
    layer_norm_eps = 1e-12
    B, S = 2, 8

    key = jax.random.PRNGKey(0)
    k1, k2, k3, k4, k5 = jax.random.split(key, 5)

    # Deterministic synthetic parameters (nn.Embedding ~ N(0,1); LayerNorm: ones/zeros).
    pos_table = jax.random.normal(k1, (max_inti_pos_index, hidden_size), jnp.float32)
    hop_table = jax.random.normal(k2, (max_hop_dis_index, hidden_size), jnp.float32)
    # time_dis_embeddings exists in __init__ but is unused in forward (reference quirk).
    gamma = jnp.ones((hidden_size,), jnp.float32)
    beta = jnp.zeros((hidden_size,), jnp.float32)

    init_pos_ids = jax.random.randint(k3, (B, S), 0, max_inti_pos_index, jnp.int32)
    hop_dis_ids = jax.random.randint(k4, (B, S), 0, max_hop_dis_index, jnp.int32)
    time_dis_ids = jax.random.randint(k5, (B, S), 0, max_hop_dis_index, jnp.int32)

    out = edge_encoding(init_pos_ids, hop_dis_ids, time_dis_ids,
                        pos_table, hop_table, gamma, beta, eps=layer_norm_eps)
    jax.block_until_ready(out)

    # Tight check: reference using the same bf16-quantized tables the kernel consumes
    # (validates the kernel's fused lookup + LayerNorm math).
    pos_q = pos_table.astype(jnp.bfloat16).astype(jnp.float32)
    hop_q = hop_table.astype(jnp.bfloat16).astype(jnp.float32)
    ref_q = pos_q[init_pos_ids] + hop_q[hop_dis_ids] + hop_q[time_dis_ids]
    ref_q = _layernorm_ref(ref_q, gamma, beta, layer_norm_eps)
    assert jnp.allclose(out, ref_q, atol=1e-4, rtol=1e-4), "mismatch vs bf16-table reference"

    # Sanity check vs the full-f32 module semantics (bf16 table quantization tolerance).
    ref = pos_table[init_pos_ids] + hop_table[hop_dis_ids] + hop_table[time_dis_ids]
    ref = _layernorm_ref(ref, gamma, beta, layer_norm_eps)
    assert jnp.allclose(out, ref, atol=7.5e-2, rtol=0.0), "mismatch vs f32 reference"

    print("KERNEL_OK")
</pallas_src>

<mosaic_0001>
module attributes {stable_mosaic.version = 11 : i64} {
  func.func @_edge_encoding_kernel(%arg0: i32, %arg1: memref<16x3xi32, #tpu.memory_space<vmem>>, %arg2: memref<64x128xbf16, #tpu.memory_space<vmem>>, %arg3: memref<1x128xf32, #tpu.memory_space<vmem>>, %arg4: memref<1x128xf32, #tpu.memory_space<vmem>>, %arg5: memref<16x128xf32, #tpu.memory_space<vmem>>) attributes {dimension_semantics = [#tpu.dimension_semantics<parallel>], iteration_bounds = array<i64: 1>, scalar_prefetch = 0 : i64, scratch_operands = 0 : i64, tpu.core_type = #tpu.core_type<tc>, window_params = [{transform_indices = @transform_0, window_bounds = array<i64: 16, 3>}, {pipeline_mode = #tpu.pipeline_mode<synchronous>, transform_indices = @transform_1, window_bounds = array<i64: 64, 128>}, {pipeline_mode = #tpu.pipeline_mode<synchronous>, transform_indices = @transform_2, window_bounds = array<i64: 1, 128>}, {pipeline_mode = #tpu.pipeline_mode<synchronous>, transform_indices = @transform_3, window_bounds = array<i64: 1, 128>}, {transform_indices = @transform_4, window_bounds = array<i64: 16, 128>}]} {
    %c0 = arith.constant 0 : index
    %c0_0 = arith.constant 0 : index
    %0 = vector.load %arg1[%c0, %c0_0] : memref<16x3xi32, #tpu.memory_space<vmem>>, vector<16x3xi32>
    %1 = vector.extract_strided_slice %0 {offsets = [0, 0], sizes = [16, 1], strides = [1, 1]} : vector<16x3xi32> to vector<16x1xi32>
    %2 = vector.extract_strided_slice %0 {offsets = [0, 1], sizes = [16, 1], strides = [1, 1]} : vector<16x3xi32> to vector<16x1xi32>
    %c32_i32 = arith.constant 32 : i32
    %3 = vector.broadcast %c32_i32 : i32 to vector<16x1xi32>
    %4 = arith.addi %2, %3 : vector<16x1xi32>
    %5 = vector.extract_strided_slice %0 {offsets = [0, 2], sizes = [16, 1], strides = [1, 1]} : vector<16x3xi32> to vector<16x1xi32>
    %c32_i32_1 = arith.constant 32 : i32
    %6 = vector.broadcast %c32_i32_1 : i32 to vector<16x1xi32>
    %7 = arith.addi %5, %6 : vector<16x1xi32>
    %8 = tpu.iota {dimensions = array<i32: 1>} : vector<16x64xi32>
    %9 = vector.broadcast %1 : vector<16x1xi32> to vector<16x64xi32>
    %10 = arith.cmpi eq, %8, %9 : vector<16x64xi32>
    %11 = arith.extui %10 : vector<16x64xi1> to vector<16x64xi32>
    %12 = vector.broadcast %4 : vector<16x1xi32> to vector<16x64xi32>
    %13 = arith.cmpi eq, %8, %12 : vector<16x64xi32>
    %14 = arith.extui %13 : vector<16x64xi1> to vector<16x64xi32>
    %15 = arith.addi %11, %14 : vector<16x64xi32>
    %16 = vector.broadcast %7 : vector<16x1xi32> to vector<16x64xi32>
    %17 = arith.cmpi eq, %8, %16 : vector<16x64xi32>
    %18 = arith.extui %17 : vector<16x64xi1> to vector<16x64xi32>
    %19 = arith.addi %15, %18 : vector<16x64xi32>
    %20 = arith.sitofp %19 : vector<16x64xi32> to vector<16x64xbf16>
    %c0_2 = arith.constant 0 : index
    %c0_3 = arith.constant 0 : index
    %21 = vector.load %arg2[%c0_2, %c0_3] : memref<64x128xbf16, #tpu.memory_space<vmem>>, vector<64x128xbf16>
    %cst = arith.constant dense<0.000000e+00> : vector<16x128xf32>
    %22 = tpu.matmul %20, %21, %cst {dimension_numbers = #tpu.dot_dimension_numbers<[1], [0], [0], [1], [0, 0, 1, 1], [], []>} : vector<16x64xbf16>, vector<64x128xbf16>, vector<16x128xf32> -> vector<16x128xf32>
    %cst_4 = arith.constant dense<0.000000e+00> : vector<16xf32>
    %23 = vector.multi_reduction <add>, %22, %cst_4 [1] : vector<16x128xf32> to vector<16xf32>
    %24 = vector.shape_cast %23 : vector<16xf32> to vector<16x1xf32>
    %cst_5 = arith.constant 3.125000e-02 : f32
    %25 = vector.broadcast %cst_5 : f32 to vector<16x1xf32>
    %26 = arith.mulf %24, %25 : vector<16x1xf32>
    %27 = vector.broadcast %26 : vector<16x1xf32> to vector<16x128xf32>
    %28 = arith.subf %22, %27 : vector<16x128xf32>
    %29 = tpu.iota {dimensions = array<i32: 1>} : vector<16x128xi32>
    %c32_i32_6 = arith.constant 32 : i32
    %30 = vector.broadcast %c32_i32_6 : i32 to vector<16x128xi32>
    %31 = arith.cmpi slt, %29, %30 : vector<16x128xi32>
    %32 = arith.extui %31 : vector<16x128xi1> to vector<16x128xi32>
    %33 = arith.sitofp %32 : vector<16x128xi32> to vector<16x128xf32>
    %34 = arith.mulf %28, %28 : vector<16x128xf32>
    %35 = arith.mulf %34, %33 : vector<16x128xf32>
    %cst_7 = arith.constant dense<0.000000e+00> : vector<16xf32>
    %36 = vector.multi_reduction <add>, %35, %cst_7 [1] : vector<16x128xf32> to vector<16xf32>
    %37 = vector.shape_cast %36 : vector<16xf32> to vector<16x1xf32>
    %cst_8 = arith.constant 3.125000e-02 : f32
    %38 = vector.broadcast %cst_8 : f32 to vector<16x1xf32>
    %39 = arith.mulf %37, %38 : vector<16x1xf32>
    %cst_9 = arith.constant 9.99999996E-13 : f32
    %40 = vector.broadcast %cst_9 : f32 to vector<16x1xf32>
    %41 = arith.addf %39, %40 : vector<16x1xf32>
    %42 = math.rsqrt %41 : vector<16x1xf32>
    %43 = vector.broadcast %42 : vector<16x1xf32> to vector<16x128xf32>
    %44 = arith.mulf %28, %43 : vector<16x128xf32>
    %c0_10 = arith.constant 0 : index
    %c0_11 = arith.constant 0 : index
    %45 = vector.load %arg3[%c0_10, %c0_11] : memref<1x128xf32, #tpu.memory_space<vmem>>, vector<1x128xf32>
    %46 = vector.broadcast %45 : vector<1x128xf32> to vector<16x128xf32>
    %47 = arith.mulf %44, %46 : vector<16x128xf32>
    %c0_12 = arith.constant 0 : index
    %c0_13 = arith.constant 0 : index
    %48 = vector.load %arg4[%c0_12, %c0_13] : memref<1x128xf32, #tpu.memory_space<vmem>>, vector<1x128xf32>
    %49 = vector.broadcast %48 : vector<1x128xf32> to vector<16x128xf32>
    %50 = arith.addf %47, %49 : vector<16x128xf32>
    %c0_14 = arith.constant 0 : index
    %c0_15 = arith.constant 0 : index
    %51 = vector.load %arg5[%c0_14, %c0_15] : memref<16x128xf32, #tpu.memory_space<vmem>>, vector<16x128xf32>
    tpu.vector_store %arg5[%c0_14, %c0_15], %50 {strides = array<i32>} : memref<16x128xf32, #tpu.memory_space<vmem>>, vector<16x128xf32>,
    return
  }
  func.func @transform_0(%arg0: i32) -> (i32, i32) {
    %c0_i32 = arith.constant 0 : i32
    %c0_i32_0 = arith.constant 0 : i32
    return %arg0, %c0_i32 : i32, i32
  }
  func.func @transform_1(%arg0: i32) -> (i32, i32) {
    %c0_i32 = arith.constant 0 : i32
    %c0_i32_0 = arith.constant 0 : i32
    %c0_i32_1 = arith.constant 0 : i32
    return %c0_i32, %c0_i32_0 : i32, i32
  }
  func.func @transform_2(%arg0: i32) -> (i32, i32) {
    %c0_i32 = arith.constant 0 : i32
    %c0_i32_0 = arith.constant 0 : i32
    %c0_i32_1 = arith.constant 0 : i32
    return %c0_i32, %c0_i32_0 : i32, i32
  }
  func.func @transform_3(%arg0: i32) -> (i32, i32) {
    %c0_i32 = arith.constant 0 : i32
    %c0_i32_0 = arith.constant 0 : i32
    %c0_i32_1 = arith.constant 0 : i32
    return %c0_i32, %c0_i32_0 : i32, i32
  }
  func.func @transform_4(%arg0: i32) -> (i32, i32) {
    %c0_i32 = arith.constant 0 : i32
    %c0_i32_0 = arith.constant 0 : i32
    return %arg0, %c0_i32 : i32, i32
  }
}

</mosaic_0001>

<bundles_post_ra>
// kernel: tpu_custom_call.1
= control target key start
LH: loop header
LB: loop body
LE: loop exit
PB: predicated region body
PF: predicated region fallthrough
CT: control target
= control target key end

     0   :  { %9 = vsyncpa [#allocation3], 0  ;;  %s385_s0 = inlined_call_operand.vmem [shape: s32[16,3], index: 0, kind: input, shape index: {}]   ;;  %s386_s1 = inlined_call_operand.hbm [shape: bf16[64,128], index: 1, kind: input, shape index: {}]   ;;  %s387_s2 = inlined_call_operand.vmem [shape: f32[1,128], index: 2, kind: input, shape index: {}]   ;;  %s388_s3 = inlined_call_operand.vmem [shape: f32[1,128], index: 3, kind: input, shape index: {}]   ;;  %s389_s4 = inlined_call_operand.hbm [shape: f32[16,128], index: 4, kind: output, shape index: {}]  }
   0x1   :  { %10 = vsyncpa [#allocation4], 0  ;;  %s313_s15 = smov [#allocation2]   ;;  %s265_s19 = scalar_lea.hbm %s386_s1, 512 }
   0x2   :  { %s18_s16 = sshll.u32 %s313_s15, 4  ;;  %p266_p0 = scmp.ne.s32.totalorder %s386_s1, %s265_s19  ;;  %s19_s16 = int_to_ptr.vmem [resolvable:$true] %s18_s16 }
   0x3   :  { %p269_p1 = scmp.lt.u32.totalorder %s265_s19, %s386_s1 }
   0x5   :  { %p271_p2 = pnand %p269_p1, %p266_p0 }
   0x7   :  { %274 = shalt.err (!%p271_p2)
}
   0x8   :  { %s275_s24 = scalar_lea.vmem %s19_s16, 512  ;;  %p280_p4 = scmp.lt.s32.totalorder %s19_s16, %s19_s16 }
   0x9   :  { %p276_p3 = scmp.ne.s32.totalorder %s19_s16, %s275_s24  ;;  %p281_p5 = scmp.lt.s32.totalorder %s275_s24, %s275_s24 }
   0xb   :  { %p282_p6 = por %p281_p5, %p280_p4 }
   0xd   :  { %p283_p7 = pnand %p282_p6, %p276_p3 }
   0xf   :  { %286 = shalt.err (!%p283_p7)
}
  0x10   :  { %s314_s25 = smov 64   ;;  %s315_s26 = smov 4  }
  0x11   :  { %24 = dma.hbm_to_vmem [thread:$0]  %s386_s1, 512, %s19_s16, [#allocation3], %s314_s25, %s314_s25, %s315_s26  }
  0x12   :  { %309 = dma.done.wait [#allocation3], 512  }
  0x13   :  { %310 = vsyncadd [#allocation3], 4294966784  ;;  %v316_v0 = vmov 0   ;;  %v317_v1 = vmov 1   ;;  %v33_v2 = vld [vmem:[%s385_s0] sm:$0xff]  ;;  %v34_v3 = vld [vmem:[%s385_s0 + $0x8] sm:$0xff]  ;;  %v37_v12 = vlaneseq }
  0x14   :  { %253 = vset.pattern.permute.xlu0 %v316_v0  ;;  %254 = vset.pattern.permute.xlu1 %v317_v1  ;;  %v35_v4 = vadd.s32 32, %v33_v2  ;;  %v36_v5 = vadd.s32 32, %v34_v3  ;;  %v257_v6 = vld [vmem:[#allocation2] sm:$0xff]   ;;  %v318_v7 = vmov 0.0   ;;  %v258_v8 = vld [vmem:[#allocation2 + $0x8] sm:$0xff]   ;;  %v319_v9 = vmov 2  }
  0x15   :  { %40 = vperm.xlu0 %253, %v33_v2   ;;  %230 = vmatprep.subr.bf16.mxu0 %v318_v7  ;;  %v259_v10 = vld [vmem:[#allocation2 + $0x10] sm:$0xff]   ;;  %v260_v11 = vld [vmem:[#allocation2 + $0x18] sm:$0xff]   ;;  %vm320_vm0 = vmmov 0   ;;  %v38_v13 = vand.u32 127, %v37_v12  ;;  %vm108_vm7 = vcmask 523264   ;;  %s321_s9 = smov [#allocation5]  }
  0x16   :  { %50 = vperm.xlu1 %254, %v35_v4   ;;  %231 = vmatpush3.bf16.msra.mxu0 %v257_v6  ;;  %v223_v55 = vld [vmem:[%s387_s2] ss:$0 sm:$0xff]  ;;  %s205_s10 = sshll.u32 %s321_s9, 4  ;;  %s206_s10 = int_to_ptr.vmem [resolvable:$true] %s205_s10 }
  0x17   :  { %232 = vmatprep.subr.bf16.mxu0 %v318_v7  ;;  %238 = vmatprep.mubr.msk.bf16.mxu0 %vm320_vm0, %v318_v7  ;;  %vm161_vm8 = vcmp.lt.s32.totalorder %v38_v13, 32  ;;  %v224_v58 = vld [vmem:[%s388_s3] ss:$0 sm:$0xff]  ;;  %s287_s11 = scalar_lea.vmem %s206_s10, 256  ;;  %p292_p9 = scmp.lt.s32.totalorder %s206_s10, %s206_s10 }
  0x18   :  { %v222_v42 = vsel %vm161_vm8, 1.0, %v318_v7  ;;  %p288_p8 = scmp.ne.s32.totalorder %s206_s10, %s287_s11  ;;  %p293_p10 = scmp.lt.s32.totalorder %s287_s11, %s287_s11 }
  0x19   :  { %43 = vperm.xlu0 %253, %v34_v3  }
  0x1a   :  { %53 = vperm.xlu1 %254, %v36_v5   ;;  %233 = vmatpush3.bf16.msra.mxu0 %v258_v8  ;;  %p294_p11 = por %p293_p10, %p292_p9 }
  0x1b   :  { %234 = vmatprep.subr.bf16.mxu0 %v318_v7 }
  0x1c   :  { %p295_p12 = pnand %p294_p11, %p288_p8 }
  0x1d   :  { %255 = vset.pattern.permute.xlu0 %v319_v9 }
  0x1e   :  { %62 = vperm.xlu0 %255, %v35_v4   ;;  %256 = vset.pattern.permute.xlu1 %v319_v9 }
  0x1f   :  { %65 = vperm.xlu1 %256, %v36_v5   ;;  %235 = vmatpush3.bf16.msra.mxu0 %v259_v10 }
  0x20   :  { %236 = vmatprep.subr.bf16.mxu0 %v318_v7 }
  0x23   :  { %237 = vmatpush3.bf16.msra.mxu0 %v260_v11 }
  0x94   :  { %v41_v14 = vpop.permute.xlu0 %40 }
  0x95   :  { %v51_v15 = vpop.permute.xlu1 %50  ;;  %vm45_vm1 = vcmp.eq.s32.totalorder %v38_v13, %v41_v14 }
  0x96   :  { %vm55_vm2 = vcmp.eq.s32.totalorder %v38_v13, %v51_v15  ;;  %v47_v18 = vsel %vm45_vm1, 1, %v316_v0 }
  0x97   :  { %v57_v19 = vsel %vm55_vm2, 1, %v316_v0 }
  0x98   :  { %v44_v16 = vpop.permute.xlu0 %43  ;;  %v59_v22 = vadd.s32 %v57_v19, %v47_v18 }
  0x99   :  { %v54_v17 = vpop.permute.xlu1 %53  ;;  %vm46_vm4 = vcmp.eq.s32.totalorder %v38_v13, %v44_v16 }
  0x9a   :  { %vm56_vm3 = vcmp.eq.s32.totalorder %v38_v13, %v54_v17  ;;  %v48_v23 = vsel %vm46_vm4, 1, %v316_v0 }
  0x9b   :  { %v58_v20 = vsel %vm56_vm3, 1, %v316_v0 }
  0x9c   :  { %v60_v26 = vadd.s32 %v58_v20, %v48_v23 }
  0x9d   :  { %v63_v21 = vpop.permute.xlu0 %62 }
  0x9e   :  { %vm67_vm5 = vcmp.eq.s32.totalorder %v38_v13, %v63_v21  ;;  %v66_v25 = vpop.permute.xlu1 %65 }
  0x9f   :  { %v69_v24 = vsel %vm67_vm5, 1, %v316_v0  ;;  %vm68_vm6 = vcmp.eq.s32.totalorder %v38_v13, %v66_v25 }
  0xa0   :  { %v71_v27 = vadd.s32 %v69_v24, %v59_v22  ;;  %v70_v28 = vsel %vm68_vm6, 1, %v316_v0 }
  0xa1   :  { %v72_v29 = vadd.s32 %v70_v28, %v60_v26 }
  0xa2   :  { %v73_v30 = vcvt.s32.f32 %v71_v27 }
  0xa3   :  { %v74_v31 = vcvt.s32.f32 %v72_v29 }
  0xa5   :  { %v75_v32 = vpack.c.bf16 %v74_v31, %v73_v30 }
  0xa7   :  { %239 = vmatmul.mubr.msk.bf16.vlgmr.msra.gmra.mrb[0].mxu0 %vm108_vm7, %v75_v32 }
 0x17a   :  { %v146_v33 = vpop.f32.mrb[0].mxu0 }
 0x17b   :  { %153 = vadd.xlane.f32.xlu1 %v146_v33  ;;  %v240_v34 = vpop.f32.mrb[1].mxu0 }
 0x17c   :  { %v149_v35 = vpop.f32.mrb[2].mxu0 }
 0x17d   :  { %155 = vadd.xlane.f32.xlu0 %v149_v35  ;;  %v241_v36 = vpop.f32.mrb[3].mxu0 }
 0x208   :  { %v154_v37 = vpop.xlane.xlu1 %153 }
 0x209   :  { %v157_v38 = vmul.f32 0.03125, %v154_v37 }
 0x20a   :  { %v156_v39 = vpop.xlane.xlu0 %155 }
 0x20b   :  { %v159_v40 = vsub.f32 %v146_v33, %v157_v38  ;;  %v158_v41 = vmul.f32 0.03125, %v156_v39 }
 0x20d   :  { %v160_v43 = vsub.f32 %v149_v35, %v158_v41  ;;  %v164_v44 = vmul.f32 %v159_v40, %v159_v40 }
 0x20f   :  { %v166_v45 = vmul.f32 %v222_v42, %v164_v44  ;;  %v165_v46 = vmul.f32 %v160_v43, %v160_v43 }
 0x211   :  { %168 = vadd.xlane.f32.xlu0 %v166_v45  ;;  %v167_v47 = vmul.f32 %v222_v42, %v165_v46 }
 0x213   :  { %170 = vadd.xlane.f32.xlu1 %v167_v47 }
 0x29e   :  { %v169_v48 = vpop.xlane.xlu0 %168 }
 0x29f   :  { %v172_v49 = vmul.f32 0.03125, %v169_v48 }
 0x2a0   :  { %v171_v50 = vpop.xlane.xlu1 %170 }
 0x2a1   :  { %v174_v51 = vadd.f32 1e-12, %v172_v49  ;;  %v173_v52 = vmul.f32 0.03125, %v171_v50 }
 0x2a3   :  { %261 = vrsqrt.f32 %v174_v51  ;;  %v175_v53 = vadd.f32 1e-12, %v173_v52 }
 0x2a5   :  { %263 = vrsqrt.f32 %v175_v53 }
 0x2ad   :  { %v262_v54 = vpop.eup %261 }
 0x2ae   :  { %v178_v56 = vmul.f32 %v262_v54, %v159_v40 }
 0x2af   :  { %v264_v57 = vpop.eup %263 }
 0x2b0   :  { %v179_v59 = vmul.f32 %v264_v57, %v160_v43  ;;  %v187_v60 = vmul.f32 %v223_v55, %v178_v56 }
 0x2b2   :  { %v188_v61 = vmul.f32 %v223_v55, %v179_v59  ;;  %v196_v62 = vadd.f32 %v224_v58, %v187_v60 }
 0x2b4   :  { %v197_v63 = vadd.f32 %v224_v58, %v188_v61  ;;  %198 = vst [vmem:[#allocation5] sm:$0xff] %v196_v62 }
 0x2b6   :  { %199 = vst [vmem:[#allocation5 + $0x8] sm:$0xff] %v197_v63 }
 0x2b7   :  { %298 = shalt.err (!%p295_p12)
}
 0x2b8   :  { %s299_s3 = scalar_lea.hbm %s389_s4, 256 }
 0x2b9   :  { %p300_p13 = scmp.ne.s32.totalorder %s389_s4, %s299_s3  ;;  %p303_p0 = scmp.lt.u32.totalorder %s299_s3, %s389_s4 }
 0x2bb   :  { %p305_p1 = pnand %p303_p0, %p300_p13 }
 0x2bd   :  { %308 = shalt.err (!%p305_p1)
}
 0x2be   :  { %s322_s17 = smov 128   ;;  %s323_s18 = smov 8  }
 0x2bf   :  { %211 = dma.vmem_to_hbm [thread:$0]  %s206_s10, 256, %s389_s4, [#allocation4], %s322_s17, %s322_s17, %s323_s18  }
 0x2c0   :  { %311 = dma.done.wait [#allocation4], 256  }
 0x2c1   :  { %312 = vsyncadd [#allocation4], 4294967040 }
 0x2c2   :  { %215 = vsyncpa [#allocation3], 1 }
 0x2c3   :  { %216 = vsyncpa [#allocation4], 1 }

</bundles_post_ra>
